<compile_context>
chip_gen: v6e
topology: v6e:2x2x1
jax: 0.10.0
libtpu: 0.0.40
codegen_flags: <defaults>
</compile_context>

<pallas_src>
import functools

import jax
import jax.numpy as jnp
from jax.experimental import pallas as pl
from jax.experimental.pallas import tpu as pltpu

_LANE = 128
_SUBLANE = 8


def _round_up(n: int, m: int) -> int:
    return ((n + m - 1) // m) * m


# ---------------------------------------------------------------------------
# Kernel
# ---------------------------------------------------------------------------
def _ponder_mlp_kernel(num_layers, lam_col, *refs):
    """refs = (x_ref, w0, b0, w1, b1, ..., out_ref).

    x_ref:  (bb, in_pad)      bf16 padded input tile
    w_i:    (K_pad, N_pad)    resident bf16 padded weights
    b_i:    (1, N_pad)        resident f32 padded biases
    out_ref:(bb, out_pad)     f32 lane-dense output slab
    """
    x_ref = refs[0]
    param_refs = refs[1:1 + 2 * num_layers]
    out_ref = refs[-1]

    h = x_ref[...]                                     # bf16 activations
    for i in range(num_layers):
        w_ref = param_refs[2 * i]
        b_ref = param_refs[2 * i + 1]
        # bf16 x bf16 -> f32 accumulation on the MXU; bias/ReLU in f32.
        acc = jnp.dot(h, w_ref[...], preferred_element_type=jnp.float32)
        acc = acc + b_ref[...]
        if i < num_layers - 1:
            acc = jnp.maximum(acc, 0.0)                # nn.ReLU
            h = acc.astype(param_refs[2 * (i + 1)].dtype)   # back to bf16
        else:
            h = acc                                    # final layer stays f32

    # Sigmoid only over the single 128-lane block that contains the lambda
    # column (always the last block); everything stays lane-aligned so stores
    # are unmasked, lane-dense vst.
    lam_blk = (lam_col // _LANE) * _LANE               # static Python int
    tail = h[:, lam_blk:]                              # (bb, 128)
    col = jax.lax.broadcasted_iota(jnp.int32, tail.shape, 1)
    tail = jnp.where(col == (lam_col - lam_blk), jax.nn.sigmoid(tail), tail)
    if lam_blk > 0:
        out_ref[:, :lam_blk] = h[:, :lam_blk].astype(out_ref.dtype)
    out_ref[:, lam_blk:] = tail.astype(out_ref.dtype)


# ---------------------------------------------------------------------------
# Parameter init (mirrors nn.Linear default init; stored padded + transposed,
# weights in bf16 for the MXU, biases in f32 for the VPU bias-add).
# ---------------------------------------------------------------------------
def init_ponder_mlp_params(key, in_dim, hidden_dims, out_dim, state_dim,
                           weight_dtype=jnp.bfloat16, bias_dtype=jnp.float32):
    dims = [in_dim + state_dim] + list(hidden_dims) + [out_dim + state_dim + 1]
    params = []
    for fan_in, fan_out in zip(dims[:-1], dims[1:]):
        key, kw, kb = jax.random.split(key, 3)
        bound = 1.0 / float(fan_in) ** 0.5
        w = jax.random.uniform(kw, (fan_in, fan_out), jnp.float32, -bound, bound)
        b = jax.random.uniform(kb, (1, fan_out), jnp.float32, -bound, bound)
        k_pad = _round_up(fan_in, _LANE)
        n_pad = _round_up(fan_out, _LANE)
        w_p = jnp.zeros((k_pad, n_pad), weight_dtype).at[:fan_in, :fan_out].set(
            w.astype(weight_dtype))
        b_p = jnp.zeros((1, n_pad), bias_dtype).at[:, :fan_out].set(
            b.astype(bias_dtype))
        params.append((w_p, b_p))
    return params


# ---------------------------------------------------------------------------
# Wrapper
# ---------------------------------------------------------------------------
def ponder_mlp_forward(x, params, *, in_dim, out_dim, state_dim, state=None,
                       block_batch=512):
    batch = x.shape[0]
    x2d = x.reshape(batch, -1)                         # x.view(batch, -1)
    assert x2d.shape[1] == in_dim, "flattened input width != in_dim"

    num_layers = len(params)
    in_pad = params[0][0].shape[0]
    out_pad = params[-1][0].shape[1]
    lam_col = out_dim + state_dim
    assert out_pad >= lam_col + 1, "last layer too narrow for out/state/lambda"
    compute_dtype = params[0][0].dtype                 # bf16

    # Feature-axis zero padding is REQUIRED: padded weight rows are zero, but
    # zero * garbage (possibly NaN) lanes would still be NaN, so the padded
    # lanes of the activations must be real zeros. When state is None, the
    # same zero padding also supplies the zero initial state columns.
    xin = x2d if state is None else jnp.concatenate((x2d, state), axis=1)
    xin = xin.astype(compute_dtype)
    if xin.shape[1] < in_pad:
        xin = jnp.pad(xin, ((0, 0), (0, in_pad - xin.shape[1])))

    # Batch tiling: no batch-dim padding (Pallas masks the ragged last block;
    # its garbage rows are row-independent and never read back). Aim for >= 2
    # blocks so both v7x TensorCores get work, derive the block from the batch
    # so the last block is never mostly padding, cap at block_batch.
    bb = max(_SUBLANE,
             min(block_batch, _round_up(pl.cdiv(batch, 2), _SUBLANE)))
    if bb > batch:
        bb = batch                 # single block == full array dim (legal)
    n_blocks = pl.cdiv(batch, bb)

    flat_params = []
    for w, b in params:
        flat_params.extend([w, b])

    # --- cost estimate ------------------------------------------------------
    param_bytes = sum(int(w.size) * w.dtype.itemsize
                      + int(b.size) * b.dtype.itemsize for w, b in params)
    layer_flops = sum(int(w.shape[0] * w.shape[1]) for w, _ in params)
    cost = pl.CostEstimate(
        flops=2 * batch * layer_flops,
        transcendentals=batch * _LANE,                 # sigmoid on one lane blk
        bytes_accessed=(batch * in_pad * xin.dtype.itemsize
                        + batch * out_pad * 4 + param_bytes),
    )

    # --- VMEM budget ----------------------------------------------------------
    try:
        phys_vmem = int(pltpu.get_tpu_info().vmem_capacity_bytes)
    except Exception:
        phys_vmem = 64 << 20                           # conservative (v7x)
    max_width = max(int(w.shape[1]) for w, _ in params)
    act_tiles = 2 * (bb * in_pad * xin.dtype.itemsize + bb * out_pad * 4)
    intermediates = 2 * bb * max_width * 4             # f32 accumulator slabs

    kernel = functools.partial(_ponder_mlp_kernel, num_layers, lam_col)
    out_shape = jax.ShapeDtypeStruct((batch, out_pad), jnp.float32)

    def build_call(single_buffer_params):
        pm = pl.Buffered(1) if single_buffer_params else None
        in_specs = [pl.BlockSpec((bb, in_pad), lambda i: (i, 0))]
        for w, b in params:
            in_specs.append(
                pl.BlockSpec(w.shape, lambda i: (0, 0), pipeline_mode=pm))
            in_specs.append(
                pl.BlockSpec(b.shape, lambda i: (0, 0), pipeline_mode=pm))
        out_specs = pl.BlockSpec((bb, out_pad), lambda i: (i, 0))

        param_mult = 1 if single_buffer_params else 2
        budget = param_mult * param_bytes + act_tiles + intermediates
        vmem_bytes = int(min(max(int(1.5 * budget), 16 << 20),
                             int(0.75 * phys_vmem)))

        return pl.pallas_call(
            kernel,
            out_shape=out_shape,
            grid_spec=pltpu.PrefetchScalarGridSpec(
                num_scalar_prefetch=0,
                grid=(n_blocks,),
                in_specs=in_specs,
                out_specs=out_specs,
            ),
            compiler_params=pltpu.CompilerParams(
                dimension_semantics=("parallel",),
                vmem_limit_bytes=vmem_bytes,
            ),
            cost_estimate=cost,
        )

    try:
        out = build_call(True)(xin, *flat_params)
    except Exception:
        # Fallback if Buffered(1) single-buffering of grid-invariant params is
        # not supported by this JAX version: default double-buffered specs.
        out = build_call(False)(xin, *flat_params)

    y_hat = out[:, :out_dim]
    new_state = out[:, out_dim:out_dim + state_dim]
    lambda_n = out[:, lam_col]       # (batch,) — keeps batch dim when batch==1
    # PyTorch returns (y_hat_n, state, lambda_n, (tensor(0), tensor(0)))
    return y_hat, new_state, lambda_n, (jnp.array(0), jnp.array(0))


# ---------------------------------------------------------------------------
# Pure-JAX reference (same bf16-weight / f32-accumulate arithmetic)
# ---------------------------------------------------------------------------
def _ref_forward(x, params, *, out_dim, state_dim, state=None):
    batch = x.shape[0]
    x2d = x.reshape(batch, -1)
    if state is None:
        state = jnp.zeros((batch, state_dim), x2d.dtype)
    xin = jnp.concatenate((x2d, state), axis=1)
    in_pad = params[0][0].shape[0]
    h = jnp.pad(xin, ((0, 0), (0, in_pad - xin.shape[1])))
    h = h.astype(params[0][0].dtype)
    for i, (w, b) in enumerate(params):
        acc = jnp.dot(h, w, preferred_element_type=jnp.float32) + b
        if i < len(params) - 1:
            h = jnp.maximum(acc, 0.0).astype(w.dtype)
        else:
            h = acc
    y = h[:, :out_dim]
    s = h[:, out_dim:out_dim + state_dim]
    lam = jax.nn.sigmoid(h[:, out_dim + state_dim])
    return y, s, lam


if __name__ == "__main__":
    # Small, module-consistent shapes.
    batch = 2
    in_dim = 16          # x is (2, 4, 2, 2) -> flattened to (2, 16)
    hidden_dims = [32, 32]
    out_dim = 8
    state_dim = 4

    key = jax.random.PRNGKey(0)
    kx, kp, ks, kx2 = jax.random.split(key, 4)
    x = jax.random.normal(kx, (batch, 4, 2, 2), jnp.float32)
    params = init_ponder_mlp_params(kp, in_dim, hidden_dims, out_dim, state_dim)

    # 1) state=None path (zero state supplied by feature-lane zero padding).
    y_hat, new_state, lambda_n, (r0, r1) = ponder_mlp_forward(
        x, params, in_dim=in_dim, out_dim=out_dim, state_dim=state_dim)
    jax.block_until_ready((y_hat, new_state, lambda_n))

    y_ref, s_ref, lam_ref = _ref_forward(
        x, params, out_dim=out_dim, state_dim=state_dim)
    assert y_hat.shape == (batch, out_dim)
    assert new_state.shape == (batch, state_dim)
    assert lambda_n.shape == (batch,)
    assert jnp.allclose(y_hat, y_ref, atol=1e-3, rtol=1e-3)
    assert jnp.allclose(new_state, s_ref, atol=1e-3, rtol=1e-3)
    assert jnp.allclose(lambda_n, lam_ref, atol=1e-3, rtol=1e-3)

    # 2) explicit-state path (exercises the concat branch).
    state0 = jax.random.normal(ks, (batch, state_dim), jnp.float32)
    y2, s2, lam2, _ = ponder_mlp_forward(
        x, params, in_dim=in_dim, out_dim=out_dim, state_dim=state_dim,
        state=state0)
    jax.block_until_ready((y2, s2, lam2))
    y2_ref, s2_ref, lam2_ref = _ref_forward(
        x, params, out_dim=out_dim, state_dim=state_dim, state=state0)
    assert jnp.allclose(y2, y2_ref, atol=1e-3, rtol=1e-3)
    assert jnp.allclose(s2, s2_ref, atol=1e-3, rtol=1e-3)
    assert jnp.allclose(lam2, lam2_ref, atol=1e-3, rtol=1e-3)

    # 3) ragged multi-block batch (no batch padding; Pallas masks last block).
    batch3 = 20
    x3 = jax.random.normal(kx2, (batch3, 4, 2, 2), jnp.float32)
    y3, s3, lam3, _ = ponder_mlp_forward(
        x3, params, in_dim=in_dim, out_dim=out_dim, state_dim=state_dim)
    jax.block_until_ready((y3, s3, lam3))
    y3_ref, s3_ref, lam3_ref = _ref_forward(
        x3, params, out_dim=out_dim, state_dim=state_dim)
    assert y3.shape == (batch3, out_dim) and lam3.shape == (batch3,)
    assert jnp.allclose(y3, y3_ref, atol=1e-3, rtol=1e-3)
    assert jnp.allclose(s3, s3_ref, atol=1e-3, rtol=1e-3)
    assert jnp.allclose(lam3, lam3_ref, atol=1e-3, rtol=1e-3)

    print("KERNEL_OK")
</pallas_src>

<mosaic_0001>
module attributes {stable_mosaic.version = 11 : i64} {
  func.func @_ponder_mlp_kernel(%arg0: i32, %arg1: memref<2x128xbf16, #tpu.memory_space<vmem>>, %arg2: memref<128x128xbf16, #tpu.memory_space<vmem>>, %arg3: memref<1x128xf32, #tpu.memory_space<vmem>>, %arg4: memref<128x128xbf16, #tpu.memory_space<vmem>>, %arg5: memref<1x128xf32, #tpu.memory_space<vmem>>, %arg6: memref<128x128xbf16, #tpu.memory_space<vmem>>, %arg7: memref<1x128xf32, #tpu.memory_space<vmem>>, %arg8: memref<2x128xf32, #tpu.memory_space<vmem>>) attributes {dimension_semantics = [#tpu.dimension_semantics<parallel>], iteration_bounds = array<i64: 1>, scalar_prefetch = 0 : i64, scratch_operands = 0 : i64, tpu.core_type = #tpu.core_type<tc>, window_params = [{transform_indices = @transform_0, window_bounds = array<i64: 2, 128>}, {pipeline_mode = #tpu.pipeline_mode<synchronous>, transform_indices = @transform_1, window_bounds = array<i64: 128, 128>}, {pipeline_mode = #tpu.pipeline_mode<synchronous>, transform_indices = @transform_2, window_bounds = array<i64: 1, 128>}, {pipeline_mode = #tpu.pipeline_mode<synchronous>, transform_indices = @transform_3, window_bounds = array<i64: 128, 128>}, {pipeline_mode = #tpu.pipeline_mode<synchronous>, transform_indices = @transform_4, window_bounds = array<i64: 1, 128>}, {pipeline_mode = #tpu.pipeline_mode<synchronous>, transform_indices = @transform_5, window_bounds = array<i64: 128, 128>}, {pipeline_mode = #tpu.pipeline_mode<synchronous>, transform_indices = @transform_6, window_bounds = array<i64: 1, 128>}, {transform_indices = @transform_7, window_bounds = array<i64: 2, 128>}]} {
    %c0 = arith.constant 0 : index
    %c0_0 = arith.constant 0 : index
    %0 = vector.load %arg1[%c0, %c0_0] : memref<2x128xbf16, #tpu.memory_space<vmem>>, vector<2x128xbf16>
    %c0_1 = arith.constant 0 : index
    %c0_2 = arith.constant 0 : index
    %1 = vector.load %arg2[%c0_1, %c0_2] : memref<128x128xbf16, #tpu.memory_space<vmem>>, vector<128x128xbf16>
    %cst = arith.constant dense<0.000000e+00> : vector<2x128xf32>
    %2 = tpu.matmul %0, %1, %cst {dimension_numbers = #tpu.dot_dimension_numbers<[1], [0], [0], [1], [0, 0, 1, 1], [], []>} : vector<2x128xbf16>, vector<128x128xbf16>, vector<2x128xf32> -> vector<2x128xf32>
    %c0_3 = arith.constant 0 : index
    %c0_4 = arith.constant 0 : index
    %3 = vector.load %arg3[%c0_3, %c0_4] : memref<1x128xf32, #tpu.memory_space<vmem>>, vector<1x128xf32>
    %4 = vector.broadcast %3 : vector<1x128xf32> to vector<2x128xf32>
    %5 = arith.addf %2, %4 : vector<2x128xf32>
    %cst_5 = arith.constant 0.000000e+00 : f32
    %6 = vector.broadcast %cst_5 : f32 to vector<2x128xf32>
    %7 = arith.maximumf %5, %6 : vector<2x128xf32>
    %8 = arith.truncf %7 : vector<2x128xf32> to vector<2x128xbf16>
    %c0_6 = arith.constant 0 : index
    %c0_7 = arith.constant 0 : index
    %9 = vector.load %arg4[%c0_6, %c0_7] : memref<128x128xbf16, #tpu.memory_space<vmem>>, vector<128x128xbf16>
    %cst_8 = arith.constant dense<0.000000e+00> : vector<2x128xf32>
    %10 = tpu.matmul %8, %9, %cst_8 {dimension_numbers = #tpu.dot_dimension_numbers<[1], [0], [0], [1], [0, 0, 1, 1], [], []>} : vector<2x128xbf16>, vector<128x128xbf16>, vector<2x128xf32> -> vector<2x128xf32>
    %c0_9 = arith.constant 0 : index
    %c0_10 = arith.constant 0 : index
    %11 = vector.load %arg5[%c0_9, %c0_10] : memref<1x128xf32, #tpu.memory_space<vmem>>, vector<1x128xf32>
    %12 = vector.broadcast %11 : vector<1x128xf32> to vector<2x128xf32>
    %13 = arith.addf %10, %12 : vector<2x128xf32>
    %cst_11 = arith.constant 0.000000e+00 : f32
    %14 = vector.broadcast %cst_11 : f32 to vector<2x128xf32>
    %15 = arith.maximumf %13, %14 : vector<2x128xf32>
    %16 = arith.truncf %15 : vector<2x128xf32> to vector<2x128xbf16>
    %c0_12 = arith.constant 0 : index
    %c0_13 = arith.constant 0 : index
    %17 = vector.load %arg6[%c0_12, %c0_13] : memref<128x128xbf16, #tpu.memory_space<vmem>>, vector<128x128xbf16>
    %cst_14 = arith.constant dense<0.000000e+00> : vector<2x128xf32>
    %18 = tpu.matmul %16, %17, %cst_14 {dimension_numbers = #tpu.dot_dimension_numbers<[1], [0], [0], [1], [0, 0, 1, 1], [], []>} : vector<2x128xbf16>, vector<128x128xbf16>, vector<2x128xf32> -> vector<2x128xf32>
    %c0_15 = arith.constant 0 : index
    %c0_16 = arith.constant 0 : index
    %19 = vector.load %arg7[%c0_15, %c0_16] : memref<1x128xf32, #tpu.memory_space<vmem>>, vector<1x128xf32>
    %20 = vector.broadcast %19 : vector<1x128xf32> to vector<2x128xf32>
    %21 = arith.addf %18, %20 : vector<2x128xf32>
    %22 = tpu.iota {dimensions = array<i32: 1>} : vector<2x128xi32>
    %c12_i32 = arith.constant 12 : i32
    %23 = vector.broadcast %c12_i32 : i32 to vector<2x128xi32>
    %24 = arith.cmpi eq, %22, %23 : vector<2x128xi32>
    %25 = arith.negf %21 : vector<2x128xf32>
    %26 = math.exp %25 : vector<2x128xf32>
    %cst_17 = arith.constant 1.000000e+00 : f32
    %27 = vector.broadcast %cst_17 : f32 to vector<2x128xf32>
    %28 = arith.addf %27, %26 : vector<2x128xf32>
    %29 = arith.divf %27, %28 : vector<2x128xf32>
    %30 = arith.select %24, %29, %21 : vector<2x128xi1>, vector<2x128xf32>
    %c0_18 = arith.constant 0 : index
    %c0_19 = arith.constant 0 : index
    %31 = vector.load %arg8[%c0_18, %c0_19] : memref<2x128xf32, #tpu.memory_space<vmem>>, vector<2x128xf32>
    tpu.vector_store %arg8[%c0_18, %c0_19], %30 {strides = array<i32>} : memref<2x128xf32, #tpu.memory_space<vmem>>, vector<2x128xf32>,
    return
  }
  func.func @transform_0(%arg0: i32) -> (i32, i32) {
    %c0_i32 = arith.constant 0 : i32
    %c0_i32_0 = arith.constant 0 : i32
    return %arg0, %c0_i32 : i32, i32
  }
  func.func @transform_1(%arg0: i32) -> (i32, i32) {
    %c0_i32 = arith.constant 0 : i32
    %c0_i32_0 = arith.constant 0 : i32
    %c0_i32_1 = arith.constant 0 : i32
    return %c0_i32, %c0_i32_0 : i32, i32
  }
  func.func @transform_2(%arg0: i32) -> (i32, i32) {
    %c0_i32 = arith.constant 0 : i32
    %c0_i32_0 = arith.constant 0 : i32
    %c0_i32_1 = arith.constant 0 : i32
    return %c0_i32, %c0_i32_0 : i32, i32
  }
  func.func @transform_3(%arg0: i32) -> (i32, i32) {
    %c0_i32 = arith.constant 0 : i32
    %c0_i32_0 = arith.constant 0 : i32
    %c0_i32_1 = arith.constant 0 : i32
    return %c0_i32, %c0_i32_0 : i32, i32
  }
  func.func @transform_4(%arg0: i32) -> (i32, i32) {
    %c0_i32 = arith.constant 0 : i32
    %c0_i32_0 = arith.constant 0 : i32
    %c0_i32_1 = arith.constant 0 : i32
    return %c0_i32, %c0_i32_0 : i32, i32
  }
  func.func @transform_5(%arg0: i32) -> (i32, i32) {
    %c0_i32 = arith.constant 0 : i32
    %c0_i32_0 = arith.constant 0 : i32
    %c0_i32_1 = arith.constant 0 : i32
    return %c0_i32, %c0_i32_0 : i32, i32
  }
  func.func @transform_6(%arg0: i32) -> (i32, i32) {
    %c0_i32 = arith.constant 0 : i32
    %c0_i32_0 = arith.constant 0 : i32
    %c0_i32_1 = arith.constant 0 : i32
    return %c0_i32, %c0_i32_0 : i32, i32
  }
  func.func @transform_7(%arg0: i32) -> (i32, i32) {
    %c0_i32 = arith.constant 0 : i32
    %c0_i32_0 = arith.constant 0 : i32
    return %arg0, %c0_i32 : i32, i32
  }
}

module attributes {stable_mosaic.version = 11 : i64} {
  func.func @_ponder_mlp_kernel(%arg0: i32, %arg1: memref<2x128xbf16, #tpu.memory_space<vmem>>, %arg2: memref<128x128xbf16, #tpu.memory_space<vmem>>, %arg3: memref<1x128xf32, #tpu.memory_space<vmem>>, %arg4: memref<128x128xbf16, #tpu.memory_space<vmem>>, %arg5: memref<1x128xf32, #tpu.memory_space<vmem>>, %arg6: memref<128x128xbf16, #tpu.memory_space<vmem>>, %arg7: memref<1x128xf32, #tpu.memory_space<vmem>>, %arg8: memref<2x128xf32, #tpu.memory_space<vmem>>) attributes {dimension_semantics = [#tpu.dimension_semantics<parallel>], iteration_bounds = array<i64: 1>, scalar_prefetch = 0 : i64, scratch_operands = 0 : i64, tpu.core_type = #tpu.core_type<tc>, window_params = [{transform_indices = @transform_0, window_bounds = array<i64: 2, 128>}, {pipeline_mode = #tpu.pipeline_mode<synchronous>, transform_indices = @transform_1, window_bounds = array<i64: 128, 128>}, {pipeline_mode = #tpu.pipeline_mode<synchronous>, transform_indices = @transform_2, window_bounds = array<i64: 1, 128>}, {pipeline_mode = #tpu.pipeline_mode<synchronous>, transform_indices = @transform_3, window_bounds = array<i64: 128, 128>}, {pipeline_mode = #tpu.pipeline_mode<synchronous>, transform_indices = @transform_4, window_bounds = array<i64: 1, 128>}, {pipeline_mode = #tpu.pipeline_mode<synchronous>, transform_indices = @transform_5, window_bounds = array<i64: 128, 128>}, {pipeline_mode = #tpu.pipeline_mode<synchronous>, transform_indices = @transform_6, window_bounds = array<i64: 1, 128>}, {transform_indices = @transform_7, window_bounds = array<i64: 2, 128>}]} {
    %c0 = arith.constant 0 : index
    %c0_0 = arith.constant 0 : index
    %0 = vector.load %arg1[%c0, %c0_0] : memref<2x128xbf16, #tpu.memory_space<vmem>>, vector<2x128xbf16>
    %c0_1 = arith.constant 0 : index
    %c0_2 = arith.constant 0 : index
    %1 = vector.load %arg2[%c0_1, %c0_2] : memref<128x128xbf16, #tpu.memory_space<vmem>>, vector<128x128xbf16>
    %cst = arith.constant dense<0.000000e+00> : vector<2x128xf32>
    %2 = tpu.matmul %0, %1, %cst {dimension_numbers = #tpu.dot_dimension_numbers<[1], [0], [0], [1], [0, 0, 1, 1], [], []>} : vector<2x128xbf16>, vector<128x128xbf16>, vector<2x128xf32> -> vector<2x128xf32>
    %c0_3 = arith.constant 0 : index
    %c0_4 = arith.constant 0 : index
    %3 = vector.load %arg3[%c0_3, %c0_4] : memref<1x128xf32, #tpu.memory_space<vmem>>, vector<1x128xf32>
    %4 = vector.broadcast %3 : vector<1x128xf32> to vector<2x128xf32>
    %5 = arith.addf %2, %4 : vector<2x128xf32>
    %cst_5 = arith.constant 0.000000e+00 : f32
    %6 = vector.broadcast %cst_5 : f32 to vector<2x128xf32>
    %7 = arith.maximumf %5, %6 : vector<2x128xf32>
    %8 = arith.truncf %7 : vector<2x128xf32> to vector<2x128xbf16>
    %c0_6 = arith.constant 0 : index
    %c0_7 = arith.constant 0 : index
    %9 = vector.load %arg4[%c0_6, %c0_7] : memref<128x128xbf16, #tpu.memory_space<vmem>>, vector<128x128xbf16>
    %cst_8 = arith.constant dense<0.000000e+00> : vector<2x128xf32>
    %10 = tpu.matmul %8, %9, %cst_8 {dimension_numbers = #tpu.dot_dimension_numbers<[1], [0], [0], [1], [0, 0, 1, 1], [], []>} : vector<2x128xbf16>, vector<128x128xbf16>, vector<2x128xf32> -> vector<2x128xf32>
    %c0_9 = arith.constant 0 : index
    %c0_10 = arith.constant 0 : index
    %11 = vector.load %arg5[%c0_9, %c0_10] : memref<1x128xf32, #tpu.memory_space<vmem>>, vector<1x128xf32>
    %12 = vector.broadcast %11 : vector<1x128xf32> to vector<2x128xf32>
    %13 = arith.addf %10, %12 : vector<2x128xf32>
    %cst_11 = arith.constant 0.000000e+00 : f32
    %14 = vector.broadcast %cst_11 : f32 to vector<2x128xf32>
    %15 = arith.maximumf %13, %14 : vector<2x128xf32>
    %16 = arith.truncf %15 : vector<2x128xf32> to vector<2x128xbf16>
    %c0_12 = arith.constant 0 : index
    %c0_13 = arith.constant 0 : index
    %17 = vector.load %arg6[%c0_12, %c0_13] : memref<128x128xbf16, #tpu.memory_space<vmem>>, vector<128x128xbf16>
    %cst_14 = arith.constant dense<0.000000e+00> : vector<2x128xf32>
    %18 = tpu.matmul %16, %17, %cst_14 {dimension_numbers = #tpu.dot_dimension_numbers<[1], [0], [0], [1], [0, 0, 1, 1], [], []>} : vector<2x128xbf16>, vector<128x128xbf16>, vector<2x128xf32> -> vector<2x128xf32>
    %c0_15 = arith.constant 0 : index
    %c0_16 = arith.constant 0 : index
    %19 = vector.load %arg7[%c0_15, %c0_16] : memref<1x128xf32, #tpu.memory_space<vmem>>, vector<1x128xf32>
    %20 = vector.broadcast %19 : vector<1x128xf32> to vector<2x128xf32>
    %21 = arith.addf %18, %20 : vector<2x128xf32>
    %22 = tpu.iota {dimensions = array<i32: 1>} : vector<2x128xi32>
    %c12_i32 = arith.constant 12 : i32
    %23 = vector.broadcast %c12_i32 : i32 to vector<2x128xi32>
    %24 = arith.cmpi eq, %22, %23 : vector<2x128xi32>
    %25 = arith.negf %21 : vector<2x128xf32>
    %26 = math.exp %25 : vector<2x128xf32>
    %cst_17 = arith.constant 1.000000e+00 : f32
    %27 = vector.broadcast %cst_17 : f32 to vector<2x128xf32>
    %28 = arith.addf %27, %26 : vector<2x128xf32>
    %29 = arith.divf %27, %28 : vector<2x128xf32>
    %30 = arith.select %24, %29, %21 : vector<2x128xi1>, vector<2x128xf32>
    %c0_18 = arith.constant 0 : index
    %c0_19 = arith.constant 0 : index
    %31 = vector.load %arg8[%c0_18, %c0_19] : memref<2x128xf32, #tpu.memory_space<vmem>>, vector<2x128xf32>
    tpu.vector_store %arg8[%c0_18, %c0_19], %30 {strides = array<i32>} : memref<2x128xf32, #tpu.memory_space<vmem>>, vector<2x128xf32>,
    return
  }
  func.func @transform_0(%arg0: i32) -> (i32, i32) {
    %c0_i32 = arith.constant 0 : i32
    %c0_i32_0 = arith.constant 0 : i32
    return %arg0, %c0_i32 : i32, i32
  }
  func.func @transform_1(%arg0: i32) -> (i32, i32) {
    %c0_i32 = arith.constant 0 : i32
    %c0_i32_0 = arith.constant 0 : i32
    %c0_i32_1 = arith.constant 0 : i32
    return %c0_i32, %c0_i32_0 : i32, i32
  }
  func.func @transform_2(%arg0: i32) -> (i32, i32) {
    %c0_i32 = arith.constant 0 : i32
    %c0_i32_0 = arith.constant 0 : i32
    %c0_i32_1 = arith.constant 0 : i32
    return %c0_i32, %c0_i32_0 : i32, i32
  }
  func.func @transform_3(%arg0: i32) -> (i32, i32) {
    %c0_i32 = arith.constant 0 : i32
    %c0_i32_0 = arith.constant 0 : i32
    %c0_i32_1 = arith.constant 0 : i32
    return %c0_i32, %c0_i32_0 : i32, i32
  }
  func.func @transform_4(%arg0: i32) -> (i32, i32) {
    %c0_i32 = arith.constant 0 : i32
    %c0_i32_0 = arith.constant 0 : i32
    %c0_i32_1 = arith.constant 0 : i32
    return %c0_i32, %c0_i32_0 : i32, i32
  }
  func.func @transform_5(%arg0: i32) -> (i32, i32) {
    %c0_i32 = arith.constant 0 : i32
    %c0_i32_0 = arith.constant 0 : i32
    %c0_i32_1 = arith.constant 0 : i32
    return %c0_i32, %c0_i32_0 : i32, i32
  }
  func.func @transform_6(%arg0: i32) -> (i32, i32) {
    %c0_i32 = arith.constant 0 : i32
    %c0_i32_0 = arith.constant 0 : i32
    %c0_i32_1 = arith.constant 0 : i32
    return %c0_i32, %c0_i32_0 : i32, i32
  }
  func.func @transform_7(%arg0: i32) -> (i32, i32) {
    %c0_i32 = arith.constant 0 : i32
    %c0_i32_0 = arith.constant 0 : i32
    return %arg0, %c0_i32 : i32, i32
  }
}

</mosaic_0001>

<bundles_post_ra>
// kernel: tpu_custom_call.1
= control target key start
LH: loop header
LB: loop body
LE: loop exit
PB: predicated region body
PF: predicated region fallthrough
CT: control target
= control target key end

     0   :  { %12 = vsyncpa [#allocation3], 0  ;;  %s819_s0 = inlined_call_operand.hbm [shape: bf16[2,128], index: 0, kind: input, shape index: {}]   ;;  %s820_s1 = inlined_call_operand.hbm [shape: bf16[128,128], index: 1, kind: input, shape index: {}]   ;;  %s821_s2 = inlined_call_operand.vmem [shape: f32[1,128], index: 2, kind: input, shape index: {}]   ;;  %s822_s3 = inlined_call_operand.hbm [shape: bf16[128,128], index: 3, kind: input, shape index: {}]   ;;  %s823_s4 = inlined_call_operand.vmem [shape: f32[1,128], index: 4, kind: input, shape index: {}]   ;;  %s824_s5 = inlined_call_operand.hbm [shape: bf16[128,128], index: 5, kind: input, shape index: {}]   ;;  %s825_s6 = inlined_call_operand.vmem [shape: f32[1,128], index: 6, kind: input, shape index: {}]   ;;  %s826_s7 = inlined_call_operand.hbm [shape: f32[2,128], index: 7, kind: output, shape index: {}]  }
   0x1   :  { %13 = vsyncpa [#allocation6], 0 }
   0x2   :  { %14 = vsyncpa [#allocation9], 0 }
   0x3   :  { %15 = vsyncpa [#allocation4], 0  ;;  %s707_s24 = smov [#allocation5]  }
   0x4   :  { %s31_s25 = sshll.u32 %s707_s24, 4  ;;  %s32_s25 = int_to_ptr.vmem [resolvable:$true] %s31_s25 }
   0x5   :  { %s607_s26 = scalar_lea.vmem %s32_s25, 1024  ;;  %p612_p1 = scmp.lt.s32.totalorder %s32_s25, %s32_s25 }
   0x6   :  { %p608_p0 = scmp.ne.s32.totalorder %s32_s25, %s607_s26  ;;  %p613_p2 = scmp.lt.s32.totalorder %s607_s26, %s607_s26 }
   0x8   :  { %p614_p3 = por %p613_p2, %p612_p1 }
   0xa   :  { %p615_p4 = pnand %p614_p3, %p608_p0 }
   0xc   :  { %618 = shalt.err (!%p615_p4)
}
   0xd   :  { %s708_s27 = smov 64   ;;  %s709_s28 = smov 4  }
   0xe   :  { %37 = dma.hbm_to_vmem [thread:$0]  %s820_s1, 1024, %s32_s25, [#allocation6], %s708_s27, %s708_s27, %s709_s28  }
   0xf   :  { %s710_s8 = smov [#allocation2]   ;;  %s711_s10 = smov [#allocation7]  }
  0x10   :  { %s22_s9 = sshll.u32 %s710_s8, 4  ;;  %s45_s11 = sshll.u32 %s711_s10, 4  ;;  %s23_s9 = int_to_ptr.vmem [resolvable:$true] %s22_s9  ;;  %s46_s11 = int_to_ptr.vmem [resolvable:$true] %s45_s11 }
  0x11   :  { %s627_s12 = scalar_lea.vmem %s23_s9, 16  ;;  %s631_s13 = scalar_lea.vmem %s23_s9, 32 }
  0x12   :  { %p628_p5 = scmp.ne.s32.totalorder %s23_s9, %s627_s12  ;;  %p632_p6 = scmp.lt.s32.totalorder %s23_s9, %s23_s9 }
  0x13   :  { %p633_p7 = scmp.lt.s32.totalorder %s631_s13, %s627_s12 }
  0x15   :  { %p634_p8 = por %p633_p7, %p632_p6 }
  0x17   :  { %p635_p9 = pnand %p634_p8, %p628_p5 }
  0x19   :  { %638 = shalt.err (!%p635_p9)
}
  0x1a   :  { %25 = dma.hbm_to_vmem [thread:$0]  %s819_s0, 16, %s23_s9, [#allocation3]  }
  0x1b   :  { %s647_s16 = scalar_lea.vmem %s46_s11, 1024  ;;  %p652_p11 = scmp.lt.s32.totalorder %s46_s11, %s46_s11 }
  0x1c   :  { %p648_p10 = scmp.ne.s32.totalorder %s46_s11, %s647_s16  ;;  %p653_p12 = scmp.lt.s32.totalorder %s647_s16, %s647_s16 }
  0x1e   :  { %p654_p13 = por %p653_p12, %p652_p11 }
  0x20   :  { %p655_p0 = pnand %p654_p13, %p648_p10 }
  0x22   :  { %658 = shalt.err (!%p655_p0)
}
  0x23   :  { %51 = dma.hbm_to_vmem [thread:$0]  %s822_s3, 1024, %s46_s11, [#allocation6], %s708_s27, %s708_s27, %s709_s28  }
  0x24   :  { %s712_s18 = smov [#allocation8]  }
  0x25   :  { %s59_s19 = sshll.u32 %s712_s18, 4  ;;  %s60_s19 = int_to_ptr.vmem [resolvable:$true] %s59_s19 }
  0x26   :  { %s667_s20 = scalar_lea.vmem %s60_s19, 1024  ;;  %p672_p2 = scmp.lt.s32.totalorder %s60_s19, %s60_s19 }
  0x27   :  { %p668_p1 = scmp.ne.s32.totalorder %s60_s19, %s667_s20  ;;  %p673_p3 = scmp.lt.s32.totalorder %s667_s20, %s667_s20 }
  0x29   :  { %p674_p4 = por %p673_p3, %p672_p2 }
  0x2b   :  { %p675_p5 = pnand %p674_p4, %p668_p1 }
  0x2d   :  { %678 = shalt.err (!%p675_p5)
}
  0x2e   :  { %65 = dma.hbm_to_vmem [thread:$0]  %s824_s5, 1024, %s60_s19, [#allocation9], %s708_s27, %s708_s27, %s709_s28  }
  0x2f   :  { %699 = dma.done.wait [#allocation3], 16  }
  0x30   :  { %700 = vsyncadd [#allocation3], 4294967280 }
  0x31   :  { %701 = dma.done.wait [#allocation6], 2048  }
  0x32   :  { %702 = vsyncadd [#allocation6], 4294965248 }
  0x33   :  { %703 = dma.done.wait [#allocation9], 1024  }
  0x34   :  { %704 = vsyncadd [#allocation9], 4294966272  ;;  %v713_v0 = vmov 0.0   ;;  %vm714_vm0 = vmmov 0   ;;  %v571_v1 = vld [vmem:[#allocation5 + $0x38] sm:$0xff]   ;;  %v572_v2 = vld [vmem:[#allocation5 + $0x30] sm:$0xff]   ;;  %v419_v51 = vlaneseq }
  0x35   :  { %502 = vmatprep.subr.bf16.mxu0 %v713_v0  ;;  %518 = vmatprep.mubr.msk.bf16.mxu0 %vm714_vm0, %v713_v0  ;;  %v573_v3 = vld [vmem:[#allocation5 + $0x28] sm:$0xff]   ;;  %v579_v4 = vld [vmem:[#allocation7 + $0x38] sm:$0xff]   ;;  %v574_v5 = vld [vmem:[#allocation5 + $0x20] sm:$0xff]  }
  0x36   :  { %522 = vmatprep.subr.bf16.mxu1 %v713_v0  ;;  %538 = vmatprep.mubr.msk.bf16.mxu1 %vm714_vm0, %v713_v0  ;;  %v580_v6 = vld [vmem:[#allocation7 + $0x30] sm:$0xff]   ;;  %v575_v7 = vld [vmem:[#allocation5 + $0x18] sm:$0xff]   ;;  %v581_v8 = vld [vmem:[#allocation7 + $0x28] sm:$0xff]   ;;  %v420_v52 = vand.u32 127, %v419_v51 }
  0x37   :  { %503 = vmatpush3.bf16.msra.mxu0 %v571_v1  ;;  %523 = vmatpush3.bf16.msra.mxu1 %v579_v4  ;;  %v576_v9 = vld [vmem:[#allocation5 + $0x10] sm:$0xff]   ;;  %v582_v10 = vld [vmem:[#allocation7 + $0x20] sm:$0xff]   ;;  %v577_v11 = vld [vmem:[#allocation5 + $0x8] sm:$0xff]  }
  0x38   :  { %504 = vmatprep.subr.bf16.mxu0 %v713_v0  ;;  %524 = vmatprep.subr.bf16.mxu1 %v713_v0  ;;  %v583_v12 = vld [vmem:[#allocation7 + $0x18] sm:$0xff]   ;;  %v578_v13 = vld [vmem:[#allocation5] sm:$0xff]   ;;  %v584_v14 = vld [vmem:[#allocation7 + $0x10] sm:$0xff]   ;;  %vm421_vm1 = vcmp.eq.s32.totalorder %v420_v52, 12 }
  0x39   :  { %v81_v15 = vld [vmem:[#allocation2] sm:$0x1]  ;;  %v585_v16 = vld [vmem:[#allocation7 + $0x8] sm:$0xff]   ;;  %v586_v17 = vld [vmem:[#allocation7] sm:$0xff]  }
  0x3a   :  { %v587_v18 = vld [vmem:[#allocation8 + $0x38] sm:$0xff]   ;;  %v588_v19 = vld [vmem:[#allocation8 + $0x30] sm:$0xff]   ;;  %v589_v20 = vld [vmem:[#allocation8 + $0x28] sm:$0xff]  }
  0x3b   :  { %505 = vmatpush3.bf16.msra.mxu0 %v572_v2  ;;  %525 = vmatpush3.bf16.msra.mxu1 %v580_v6  ;;  %v590_v21 = vld [vmem:[#allocation8 + $0x20] sm:$0xff]   ;;  %v591_v22 = vld [vmem:[#allocation8 + $0x18] sm:$0xff]   ;;  %v592_v23 = vld [vmem:[#allocation8 + $0x10] sm:$0xff]  }
  0x3c   :  { %506 = vmatprep.subr.bf16.mxu0 %v713_v0  ;;  %526 = vmatprep.subr.bf16.mxu1 %v713_v0  ;;  %v447_v24 = vld [vmem:[%s821_s2] ss:$0 sm:$0xff]  ;;  %v593_v32 = vld [vmem:[#allocation8 + $0x8] sm:$0xff]   ;;  %v594_v33 = vld [vmem:[#allocation8] sm:$0xff]  }
  0x3d   :  { %v456_v34 = vld [vmem:[%s823_s4] ss:$0 sm:$0xff]  ;;  %s715_s4 = smov [#allocation10]  }
  0x3e   :  { %v465_v42 = vld [vmem:[%s825_s6] ss:$0 sm:$0xff]  ;;  %s436_s25 = sshll.u32 %s715_s4, 4  ;;  %s437_s25 = int_to_ptr.vmem [resolvable:$true] %s436_s25 }
  0x3f   :  { %507 = vmatpush3.bf16.msra.mxu0 %v573_v3  ;;  %527 = vmatpush3.bf16.msra.mxu1 %v581_v8  ;;  %s679_s6 = scalar_lea.vmem %s437_s25, 32  ;;  %p684_p7 = scmp.lt.s32.totalorder %s437_s25, %s437_s25 }
  0x40   :  { %508 = vmatprep.subr.bf16.mxu0 %v713_v0  ;;  %528 = vmatprep.subr.bf16.mxu1 %v713_v0  ;;  %p680_p6 = scmp.ne.s32.totalorder %s437_s25, %s679_s6  ;;  %p685_p8 = scmp.lt.s32.totalorder %s679_s6, %s679_s6 }
  0x42   :  { %p686_p9 = por %p685_p8, %p684_p7 }
  0x43   :  { %509 = vmatpush3.bf16.msra.mxu0 %v574_v5  ;;  %529 = vmatpush3.bf16.msra.mxu1 %v582_v10 }
  0x44   :  { %510 = vmatprep.subr.bf16.mxu0 %v713_v0  ;;  %530 = vmatprep.subr.bf16.mxu1 %v713_v0  ;;  %p687_p10 = pnand %p686_p9, %p680_p6 }
  0x47   :  { %511 = vmatpush3.bf16.msra.mxu0 %v575_v7  ;;  %531 = vmatpush3.bf16.msra.mxu1 %v583_v12 }
  0x48   :  { %512 = vmatprep.subr.bf16.mxu0 %v713_v0  ;;  %532 = vmatprep.subr.bf16.mxu1 %v713_v0 }
  0x4b   :  { %513 = vmatpush3.bf16.msra.mxu0 %v576_v9  ;;  %533 = vmatpush3.bf16.msra.mxu1 %v584_v14 }
  0x4c   :  { %514 = vmatprep.subr.bf16.mxu0 %v713_v0  ;;  %534 = vmatprep.subr.bf16.mxu1 %v713_v0 }
  0x4f   :  { %515 = vmatpush3.bf16.msra.mxu0 %v577_v11  ;;  %535 = vmatpush3.bf16.msra.mxu1 %v585_v16 }
  0x50   :  { %516 = vmatprep.subr.bf16.mxu0 %v713_v0  ;;  %536 = vmatprep.subr.bf16.mxu1 %v713_v0 }
  0x53   :  { %517 = vmatpush3.bf16.msra.mxu0 %v578_v13  ;;  %537 = vmatpush3.bf16.msra.mxu1 %v586_v17 }
  0x54   :  { %542 = vmatprep.subr.bf16.mxu0 %v713_v0 }
  0x56   :  { %519 = vmatmul.mubr.bf16.vlgmr.msra.gmra.mxu0 %v81_v15 }
  0x57   :  { %558 = vmatprep.mubr.msk.bf16.mxu0 %vm714_vm0, %v713_v0  ;;  %543 = vmatpush3.bf16.msra.mxu0 %v587_v18 }
  0x58   :  { %544 = vmatprep.subr.bf16.mxu0 %v713_v0 }
  0x5b   :  { %545 = vmatpush3.bf16.msra.mxu0 %v588_v19 }
  0x5c   :  { %546 = vmatprep.subr.bf16.mxu0 %v713_v0 }
  0x5f   :  { %547 = vmatpush3.bf16.msra.mxu0 %v589_v20 }
  0x60   :  { %548 = vmatprep.subr.bf16.mxu0 %v713_v0 }
  0x63   :  { %549 = vmatpush3.bf16.msra.mxu0 %v590_v21 }
  0x64   :  { %550 = vmatprep.subr.bf16.mxu0 %v713_v0 }
  0x67   :  { %551 = vmatpush3.bf16.msra.mxu0 %v591_v22 }
  0x68   :  { %552 = vmatprep.subr.bf16.mxu0 %v713_v0 }
  0x6b   :  { %553 = vmatpush3.bf16.msra.mxu0 %v592_v23 }
  0x6c   :  { %554 = vmatprep.subr.bf16.mxu0 %v713_v0 }
  0x6f   :  { %555 = vmatpush3.bf16.msra.mxu0 %v593_v32 }
  0x70   :  { %556 = vmatprep.subr.bf16.mxu0 %v713_v0 }
  0x73   :  { %557 = vmatpush3.bf16.msra.mxu0 %v594_v33 }
 0x116   :  { %v187_v25 = vpop.f32.mrf.mxu0 }
 0x117   :  { %v188_v26 = vadd.f32 %v447_v24, %v187_v25 }
 0x118   :  { %v520_v27 = vpop.f32.mrf.mxu0 }
 0x119   :  { %v193_v28 = vmax.f32 %v188_v26, 0.0 }
 0x11a   :  { %v190_v29 = vpop.f32.mrf.mxu0 }
 0x11b   :  { %v194_v30 = vpack.c.bf16 %v193_v28, %v193_v28 }
 0x11c   :  { %v521_v31 = vpop.f32.mrf.mxu0 }
 0x11d   :  { %539 = vmatmul.mubr.bf16.vlgmr.msra.gmra.mxu1 %v194_v30 }
 0x1dd   :  { %v300_v35 = vpop.f32.mrf.mxu1 }
 0x1de   :  { %v301_v36 = vadd.f32 %v456_v34, %v300_v35 }
 0x1df   :  { %v540_v37 = vpop.f32.mrf.mxu1 }
 0x1e0   :  { %v306_v38 = vmax.f32 %v301_v36, 0.0 }
 0x1e1   :  { %v303_v39 = vpop.f32.mrf.mxu1 }
 0x1e2   :  { %v307_v40 = vpack.c.bf16 %v306_v38, %v306_v38 }
 0x1e3   :  { %v541_v41 = vpop.f32.mrf.mxu1 }
 0x1e4   :  { %559 = vmatmul.mubr.bf16.vlgmr.msra.gmra.mxu0 %v307_v40 }
 0x2a4   :  { %v413_v43 = vpop.f32.mrf.mxu0 }
 0x2a5   :  { %v414_v44 = vadd.f32 %v465_v42, %v413_v43 }
 0x2a6   :  { %v560_v45 = vpop.f32.mrf.mxu0 }
 0x2a7   :  { %v474_v46 = vmul.f32 -1.442695, %v414_v44 }
 0x2a8   :  { %v416_v47 = vpop.f32.mrf.mxu0 }
 0x2a9   :  { %595 = vpow2.f32 %v474_v46 }
 0x2aa   :  { %v561_v48 = vpop.f32.mrf.mxu0 }
 0x2b6   :  { %v596_v49 = vpop.eup %595 }
 0x2b7   :  { %v425_v50 = vadd.f32 1.0, %v596_v49 }
 0x2b9   :  { %597 = vrcp.f32 %v425_v50 }
 0x2c6   :  { %v598_v53 = vpop.eup %597 }
 0x2c7   :  { %v428_v54 = vsel %vm421_vm1, %v598_v53, %v414_v44 }
 0x2c8   :  { %429 = vst [vmem:[#allocation10] sm:$0x3] %v428_v54 }
 0x2c9   :  { %690 = shalt.err (!%p687_p10)
}
 0x2ca   :  { %439 = dma.vmem_to_hbm [thread:$0]  %s437_s25, 32, %s826_s7, [#allocation4]  }
 0x2cb   :  { %705 = dma.done.wait [#allocation4], 32  }
 0x2cc   :  { %706 = vsyncadd [#allocation4], 4294967264 }
 0x2cd   :  { %443 = vsyncpa [#allocation3], 1 }
 0x2ce   :  { %444 = vsyncpa [#allocation6], 1 }
 0x2cf   :  { %445 = vsyncpa [#allocation9], 1 }
 0x2d0   :  { %446 = vsyncpa [#allocation4], 1 }

// kernel: tpu_custom_call.1
= control target key start
LH: loop header
LB: loop body
LE: loop exit
PB: predicated region body
PF: predicated region fallthrough
CT: control target
= control target key end

     0   :  { %12 = vsyncpa [#allocation3], 0  ;;  %s819_s0 = inlined_call_operand.hbm [shape: bf16[2,128], index: 0, kind: input, shape index: {}]   ;;  %s820_s1 = inlined_call_operand.hbm [shape: bf16[128,128], index: 1, kind: input, shape index: {}]   ;;  %s821_s2 = inlined_call_operand.vmem [shape: f32[1,128], index: 2, kind: input, shape index: {}]   ;;  %s822_s3 = inlined_call_operand.hbm [shape: bf16[128,128], index: 3, kind: input, shape index: {}]   ;;  %s823_s4 = inlined_call_operand.vmem [shape: f32[1,128], index: 4, kind: input, shape index: {}]   ;;  %s824_s5 = inlined_call_operand.hbm [shape: bf16[128,128], index: 5, kind: input, shape index: {}]   ;;  %s825_s6 = inlined_call_operand.vmem [shape: f32[1,128], index: 6, kind: input, shape index: {}]   ;;  %s826_s7 = inlined_call_operand.hbm [shape: f32[2,128], index: 7, kind: output, shape index: {}]  }
   0x1   :  { %13 = vsyncpa [#allocation6], 0 }
   0x2   :  { %14 = vsyncpa [#allocation9], 0 }
   0x3   :  { %15 = vsyncpa [#allocation4], 0  ;;  %s707_s24 = smov [#allocation5]  }
   0x4   :  { %s31_s25 = sshll.u32 %s707_s24, 4  ;;  %s32_s25 = int_to_ptr.vmem [resolvable:$true] %s31_s25 }
   0x5   :  { %s607_s26 = scalar_lea.vmem %s32_s25, 1024  ;;  %p612_p1 = scmp.lt.s32.totalorder %s32_s25, %s32_s25 }
   0x6   :  { %p608_p0 = scmp.ne.s32.totalorder %s32_s25, %s607_s26  ;;  %p613_p2 = scmp.lt.s32.totalorder %s607_s26, %s607_s26 }
   0x8   :  { %p614_p3 = por %p613_p2, %p612_p1 }
   0xa   :  { %p615_p4 = pnand %p614_p3, %p608_p0 }
   0xc   :  { %618 = shalt.err (!%p615_p4)
}
   0xd   :  { %s708_s27 = smov 64   ;;  %s709_s28 = smov 4  }
   0xe   :  { %37 = dma.hbm_to_vmem [thread:$0]  %s820_s1, 1024, %s32_s25, [#allocation6], %s708_s27, %s708_s27, %s709_s28  }
   0xf   :  { %s710_s8 = smov [#allocation2]   ;;  %s711_s10 = smov [#allocation7]  }
  0x10   :  { %s22_s9 = sshll.u32 %s710_s8, 4  ;;  %s45_s11 = sshll.u32 %s711_s10, 4  ;;  %s23_s9 = int_to_ptr.vmem [resolvable:$true] %s22_s9  ;;  %s46_s11 = int_to_ptr.vmem [resolvable:$true] %s45_s11 }
  0x11   :  { %s627_s12 = scalar_lea.vmem %s23_s9, 16  ;;  %s631_s13 = scalar_lea.vmem %s23_s9, 32 }
  0x12   :  { %p628_p5 = scmp.ne.s32.totalorder %s23_s9, %s627_s12  ;;  %p632_p6 = scmp.lt.s32.totalorder %s23_s9, %s23_s9 }
  0x13   :  { %p633_p7 = scmp.lt.s32.totalorder %s631_s13, %s627_s12 }
  0x15   :  { %p634_p8 = por %p633_p7, %p632_p6 }
  0x17   :  { %p635_p9 = pnand %p634_p8, %p628_p5 }
  0x19   :  { %638 = shalt.err (!%p635_p9)
}
  0x1a   :  { %25 = dma.hbm_to_vmem [thread:$0]  %s819_s0, 16, %s23_s9, [#allocation3]  }
  0x1b   :  { %s647_s16 = scalar_lea.vmem %s46_s11, 1024  ;;  %p652_p11 = scmp.lt.s32.totalorder %s46_s11, %s46_s11 }
  0x1c   :  { %p648_p10 = scmp.ne.s32.totalorder %s46_s11, %s647_s16  ;;  %p653_p12 = scmp.lt.s32.totalorder %s647_s16, %s647_s16 }
  0x1e   :  { %p654_p13 = por %p653_p12, %p652_p11 }
  0x20   :  { %p655_p0 = pnand %p654_p13, %p648_p10 }
  0x22   :  { %658 = shalt.err (!%p655_p0)
}
  0x23   :  { %51 = dma.hbm_to_vmem [thread:$0]  %s822_s3, 1024, %s46_s11, [#allocation6], %s708_s27, %s708_s27, %s709_s28  }
  0x24   :  { %s712_s18 = smov [#allocation8]  }
  0x25   :  { %s59_s19 = sshll.u32 %s712_s18, 4  ;;  %s60_s19 = int_to_ptr.vmem [resolvable:$true] %s59_s19 }
  0x26   :  { %s667_s20 = scalar_lea.vmem %s60_s19, 1024  ;;  %p672_p2 = scmp.lt.s32.totalorder %s60_s19, %s60_s19 }
  0x27   :  { %p668_p1 = scmp.ne.s32.totalorder %s60_s19, %s667_s20  ;;  %p673_p3 = scmp.lt.s32.totalorder %s667_s20, %s667_s20 }
  0x29   :  { %p674_p4 = por %p673_p3, %p672_p2 }
  0x2b   :  { %p675_p5 = pnand %p674_p4, %p668_p1 }
  0x2d   :  { %678 = shalt.err (!%p675_p5)
}
  0x2e   :  { %65 = dma.hbm_to_vmem [thread:$0]  %s824_s5, 1024, %s60_s19, [#allocation9], %s708_s27, %s708_s27, %s709_s28  }
  0x2f   :  { %699 = dma.done.wait [#allocation3], 16  }
  0x30   :  { %700 = vsyncadd [#allocation3], 4294967280 }
  0x31   :  { %701 = dma.done.wait [#allocation6], 2048  }
  0x32   :  { %702 = vsyncadd [#allocation6], 4294965248 }
  0x33   :  { %703 = dma.done.wait [#allocation9], 1024  }
  0x34   :  { %704 = vsyncadd [#allocation9], 4294966272  ;;  %v713_v0 = vmov 0.0   ;;  %vm714_vm0 = vmmov 0   ;;  %v571_v1 = vld [vmem:[#allocation5 + $0x38] sm:$0xff]   ;;  %v572_v2 = vld [vmem:[#allocation5 + $0x30] sm:$0xff]   ;;  %v419_v51 = vlaneseq }
  0x35   :  { %502 = vmatprep.subr.bf16.mxu0 %v713_v0  ;;  %518 = vmatprep.mubr.msk.bf16.mxu0 %vm714_vm0, %v713_v0  ;;  %v573_v3 = vld [vmem:[#allocation5 + $0x28] sm:$0xff]   ;;  %v579_v4 = vld [vmem:[#allocation7 + $0x38] sm:$0xff]   ;;  %v574_v5 = vld [vmem:[#allocation5 + $0x20] sm:$0xff]  }
  0x36   :  { %522 = vmatprep.subr.bf16.mxu1 %v713_v0  ;;  %538 = vmatprep.mubr.msk.bf16.mxu1 %vm714_vm0, %v713_v0  ;;  %v580_v6 = vld [vmem:[#allocation7 + $0x30] sm:$0xff]   ;;  %v575_v7 = vld [vmem:[#allocation5 + $0x18] sm:$0xff]   ;;  %v581_v8 = vld [vmem:[#allocation7 + $0x28] sm:$0xff]   ;;  %v420_v52 = vand.u32 127, %v419_v51 }
  0x37   :  { %503 = vmatpush3.bf16.msra.mxu0 %v571_v1  ;;  %523 = vmatpush3.bf16.msra.mxu1 %v579_v4  ;;  %v576_v9 = vld [vmem:[#allocation5 + $0x10] sm:$0xff]   ;;  %v582_v10 = vld [vmem:[#allocation7 + $0x20] sm:$0xff]   ;;  %v577_v11 = vld [vmem:[#allocation5 + $0x8] sm:$0xff]  }
  0x38   :  { %504 = vmatprep.subr.bf16.mxu0 %v713_v0  ;;  %524 = vmatprep.subr.bf16.mxu1 %v713_v0  ;;  %v583_v12 = vld [vmem:[#allocation7 + $0x18] sm:$0xff]   ;;  %v578_v13 = vld [vmem:[#allocation5] sm:$0xff]   ;;  %v584_v14 = vld [vmem:[#allocation7 + $0x10] sm:$0xff]   ;;  %vm421_vm1 = vcmp.eq.s32.totalorder %v420_v52, 12 }
  0x39   :  { %v81_v15 = vld [vmem:[#allocation2] sm:$0x1]  ;;  %v585_v16 = vld [vmem:[#allocation7 + $0x8] sm:$0xff]   ;;  %v586_v17 = vld [vmem:[#allocation7] sm:$0xff]  }
  0x3a   :  { %v587_v18 = vld [vmem:[#allocation8 + $0x38] sm:$0xff]   ;;  %v588_v19 = vld [vmem:[#allocation8 + $0x30] sm:$0xff]   ;;  %v589_v20 = vld [vmem:[#allocation8 + $0x28] sm:$0xff]  }
  0x3b   :  { %505 = vmatpush3.bf16.msra.mxu0 %v572_v2  ;;  %525 = vmatpush3.bf16.msra.mxu1 %v580_v6  ;;  %v590_v21 = vld [vmem:[#allocation8 + $0x20] sm:$0xff]   ;;  %v591_v22 = vld [vmem:[#allocation8 + $0x18] sm:$0xff]   ;;  %v592_v23 = vld [vmem:[#allocation8 + $0x10] sm:$0xff]  }
  0x3c   :  { %506 = vmatprep.subr.bf16.mxu0 %v713_v0  ;;  %526 = vmatprep.subr.bf16.mxu1 %v713_v0  ;;  %v447_v24 = vld [vmem:[%s821_s2] ss:$0 sm:$0xff]  ;;  %v593_v32 = vld [vmem:[#allocation8 + $0x8] sm:$0xff]   ;;  %v594_v33 = vld [vmem:[#allocation8] sm:$0xff]  }
  0x3d   :  { %v456_v34 = vld [vmem:[%s823_s4] ss:$0 sm:$0xff]  ;;  %s715_s4 = smov [#allocation10]  }
  0x3e   :  { %v465_v42 = vld [vmem:[%s825_s6] ss:$0 sm:$0xff]  ;;  %s436_s25 = sshll.u32 %s715_s4, 4  ;;  %s437_s25 = int_to_ptr.vmem [resolvable:$true] %s436_s25 }
  0x3f   :  { %507 = vmatpush3.bf16.msra.mxu0 %v573_v3  ;;  %527 = vmatpush3.bf16.msra.mxu1 %v581_v8  ;;  %s679_s6 = scalar_lea.vmem %s437_s25, 32  ;;  %p684_p7 = scmp.lt.s32.totalorder %s437_s25, %s437_s25 }
  0x40   :  { %508 = vmatprep.subr.bf16.mxu0 %v713_v0  ;;  %528 = vmatprep.subr.bf16.mxu1 %v713_v0  ;;  %p680_p6 = scmp.ne.s32.totalorder %s437_s25, %s679_s6  ;;  %p685_p8 = scmp.lt.s32.totalorder %s679_s6, %s679_s6 }
  0x42   :  { %p686_p9 = por %p685_p8, %p684_p7 }
  0x43   :  { %509 = vmatpush3.bf16.msra.mxu0 %v574_v5  ;;  %529 = vmatpush3.bf16.msra.mxu1 %v582_v10 }
  0x44   :  { %510 = vmatprep.subr.bf16.mxu0 %v713_v0  ;;  %530 = vmatprep.subr.bf16.mxu1 %v713_v0  ;;  %p687_p10 = pnand %p686_p9, %p680_p6 }
  0x47   :  { %511 = vmatpush3.bf16.msra.mxu0 %v575_v7  ;;  %531 = vmatpush3.bf16.msra.mxu1 %v583_v12 }
  0x48   :  { %512 = vmatprep.subr.bf16.mxu0 %v713_v0  ;;  %532 = vmatprep.subr.bf16.mxu1 %v713_v0 }
  0x4b   :  { %513 = vmatpush3.bf16.msra.mxu0 %v576_v9  ;;  %533 = vmatpush3.bf16.msra.mxu1 %v584_v14 }
  0x4c   :  { %514 = vmatprep.subr.bf16.mxu0 %v713_v0  ;;  %534 = vmatprep.subr.bf16.mxu1 %v713_v0 }
  0x4f   :  { %515 = vmatpush3.bf16.msra.mxu0 %v577_v11  ;;  %535 = vmatpush3.bf16.msra.mxu1 %v585_v16 }
  0x50   :  { %516 = vmatprep.subr.bf16.mxu0 %v713_v0  ;;  %536 = vmatprep.subr.bf16.mxu1 %v713_v0 }
  0x53   :  { %517 = vmatpush3.bf16.msra.mxu0 %v578_v13  ;;  %537 = vmatpush3.bf16.msra.mxu1 %v586_v17 }
  0x54   :  { %542 = vmatprep.subr.bf16.mxu0 %v713_v0 }
  0x56   :  { %519 = vmatmul.mubr.bf16.vlgmr.msra.gmra.mxu0 %v81_v15 }
  0x57   :  { %558 = vmatprep.mubr.msk.bf16.mxu0 %vm714_vm0, %v713_v0  ;;  %543 = vmatpush3.bf16.msra.mxu0 %v587_v18 }
  0x58   :  { %544 = vmatprep.subr.bf16.mxu0 %v713_v0 }
  0x5b   :  { %545 = vmatpush3.bf16.msra.mxu0 %v588_v19 }
  0x5c   :  { %546 = vmatprep.subr.bf16.mxu0 %v713_v0 }
  0x5f   :  { %547 = vmatpush3.bf16.msra.mxu0 %v589_v20 }
  0x60   :  { %548 = vmatprep.subr.bf16.mxu0 %v713_v0 }
  0x63   :  { %549 = vmatpush3.bf16.msra.mxu0 %v590_v21 }
  0x64   :  { %550 = vmatprep.subr.bf16.mxu0 %v713_v0 }
  0x67   :  { %551 = vmatpush3.bf16.msra.mxu0 %v591_v22 }
  0x68   :  { %552 = vmatprep.subr.bf16.mxu0 %v713_v0 }
  0x6b   :  { %553 = vmatpush3.bf16.msra.mxu0 %v592_v23 }
  0x6c   :  { %554 = vmatprep.subr.bf16.mxu0 %v713_v0 }
  0x6f   :  { %555 = vmatpush3.bf16.msra.mxu0 %v593_v32 }
  0x70   :  { %556 = vmatprep.subr.bf16.mxu0 %v713_v0 }
  0x73   :  { %557 = vmatpush3.bf16.msra.mxu0 %v594_v33 }
 0x116   :  { %v187_v25 = vpop.f32.mrf.mxu0 }
 0x117   :  { %v188_v26 = vadd.f32 %v447_v24, %v187_v25 }
 0x118   :  { %v520_v27 = vpop.f32.mrf.mxu0 }
 0x119   :  { %v193_v28 = vmax.f32 %v188_v26, 0.0 }
 0x11a   :  { %v190_v29 = vpop.f32.mrf.mxu0 }
 0x11b   :  { %v194_v30 = vpack.c.bf16 %v193_v28, %v193_v28 }
 0x11c   :  { %v521_v31 = vpop.f32.mrf.mxu0 }
 0x11d   :  { %539 = vmatmul.mubr.bf16.vlgmr.msra.gmra.mxu1 %v194_v30 }
 0x1dd   :  { %v300_v35 = vpop.f32.mrf.mxu1 }
 0x1de   :  { %v301_v36 = vadd.f32 %v456_v34, %v300_v35 }
 0x1df   :  { %v540_v37 = vpop.f32.mrf.mxu1 }
 0x1e0   :  { %v306_v38 = vmax.f32 %v301_v36, 0.0 }
 0x1e1   :  { %v303_v39 = vpop.f32.mrf.mxu1 }
 0x1e2   :  { %v307_v40 = vpack.c.bf16 %v306_v38, %v306_v38 }
 0x1e3   :  { %v541_v41 = vpop.f32.mrf.mxu1 }
 0x1e4   :  { %559 = vmatmul.mubr.bf16.vlgmr.msra.gmra.mxu0 %v307_v40 }
 0x2a4   :  { %v413_v43 = vpop.f32.mrf.mxu0 }
 0x2a5   :  { %v414_v44 = vadd.f32 %v465_v42, %v413_v43 }
 0x2a6   :  { %v560_v45 = vpop.f32.mrf.mxu0 }
 0x2a7   :  { %v474_v46 = vmul.f32 -1.442695, %v414_v44 }
 0x2a8   :  { %v416_v47 = vpop.f32.mrf.mxu0 }
 0x2a9   :  { %595 = vpow2.f32 %v474_v46 }
 0x2aa   :  { %v561_v48 = vpop.f32.mrf.mxu0 }
 0x2b6   :  { %v596_v49 = vpop.eup %595 }
 0x2b7   :  { %v425_v50 = vadd.f32 1.0, %v596_v49 }
 0x2b9   :  { %597 = vrcp.f32 %v425_v50 }
 0x2c6   :  { %v598_v53 = vpop.eup %597 }
 0x2c7   :  { %v428_v54 = vsel %vm421_vm1, %v598_v53, %v414_v44 }
 0x2c8   :  { %429 = vst [vmem:[#allocation10] sm:$0x3] %v428_v54 }
 0x2c9   :  { %690 = shalt.err (!%p687_p10)
}
 0x2ca   :  { %439 = dma.vmem_to_hbm [thread:$0]  %s437_s25, 32, %s826_s7, [#allocation4]  }
 0x2cb   :  { %705 = dma.done.wait [#allocation4], 32  }
 0x2cc   :  { %706 = vsyncadd [#allocation4], 4294967264 }
 0x2cd   :  { %443 = vsyncpa [#allocation3], 1 }
 0x2ce   :  { %444 = vsyncpa [#allocation6], 1 }
 0x2cf   :  { %445 = vsyncpa [#allocation9], 1 }
 0x2d0   :  { %446 = vsyncpa [#allocation4], 1 }

</bundles_post_ra>
